<compile_context>
chip_gen: v7x
topology: tpu7x:2x2x1
jax: 0.10.0
libtpu: 0.0.40
codegen_flags: <defaults>
</compile_context>

<pallas_src>
import jax
import jax.numpy as jnp
from jax.experimental import pallas as pl
from jax.experimental.pallas import tpu as pltpu

# ---- model hyper-parameters (consistent with the module) --------------------
D = 16              # board_size == action_size == d_model
NUM_HEADS = 2       # args.num_heads
HEAD_DIM = D // NUM_HEADS
HIDDEN = 32         # args.hidden_dim (dim_feedforward)
NUM_BLOCKS = 2      # args.num_blocks
EPS_LN = 1e-5
EPS_BN = 1e-5
OUT_LANES = 128     # lane-dense combined output width

# ---- static slab layout ------------------------------------------------------
# weight slab rows (bf16): per layer  [Wqkv^T | Wo^T | W1^T | W2^T]
W_QKV_OFF = 0                      # rows [0, D)        lanes [0, 3D)
W_WO_OFF = D                       # rows [D, 2D)       lanes [0, D)
W_W1_OFF = 2 * D                   # rows [2D, 3D)      lanes [0, HIDDEN)
W_W2_OFF = 3 * D                   # rows [3D, 3D+H)    lanes [0, D)
W_ROWS_PER_LAYER = 3 * D + HIDDEN  # 80
W_HEAD_BASE = NUM_BLOCKS * W_ROWS_PER_LAYER         # fc3|fc4 fused weight
W_ROWS = W_HEAD_BASE + D                             # 176 (multiple of 16 for bf16)

# vector slab rows (f32): per layer [b_qkv, b_o, b_1, b_2, g1, be1, g2, be2]
V_ROWS_PER_LAYER = 8
V_HEAD_BASE = NUM_BLOCKS * V_ROWS_PER_LAYER          # [bn_scale, bn_bias, b_34]
V_ROWS = ((V_HEAD_BASE + 3 + 7) // 8) * 8            # pad to multiple of 8 -> 24


# ----------------------------------------------------------------------------
# Fused Pallas kernel: NUM_BLOCKS x TransformerEncoderLayer (post-norm, relu)
#                      -> BatchNorm1d(eval) -> relu -> [fc3 | fc4] -> log_softmax / tanh
# ----------------------------------------------------------------------------
def fused_forward_kernel(x_ref, w_ref, p_ref, out_ref):
    f32 = jnp.float32
    bf16 = jnp.bfloat16
    x = x_ref[...].astype(f32)                               # (N, D)
    n = x.shape[0]

    def mm(a, w_bf):                                         # bf16 MXU, f32 accumulate
        return jnp.dot(a.astype(bf16), w_bf, preferred_element_type=f32)

    for l in range(NUM_BLOCKS):                              # static unroll over layers
        wb = l * W_ROWS_PER_LAYER
        vb = l * V_ROWS_PER_LAYER

        # ---- fused Q/K/V projection: one (N,D)@(D,3D) matmul (scale folded in Q) ----
        qkv = mm(x, w_ref[wb + W_QKV_OFF: wb + W_QKV_OFF + D, 0:3 * D]) \
            + p_ref[vb + 0: vb + 1, 0:3 * D]                 # (N, 3D)

        heads = []
        for h in range(NUM_HEADS):                           # static unroll over heads
            q = qkv[:, h * HEAD_DIM:(h + 1) * HEAD_DIM]
            k = qkv[:, D + h * HEAD_DIM: D + (h + 1) * HEAD_DIM]
            vh = qkv[:, 2 * D + h * HEAD_DIM: 2 * D + (h + 1) * HEAD_DIM]

            # scores[i, j] = q[i] . k[j]   (contract last dims, no transpose)
            scores = jax.lax.dot_general(
                q.astype(bf16), k.astype(bf16),
                (((1,), (1,)), ((), ())), preferred_element_type=f32)
            scores = scores - jnp.max(scores, axis=-1, keepdims=True)
            p = jnp.exp(scores)
            p = p / jnp.sum(p, axis=-1, keepdims=True)       # exact softmax (f32)

            heads.append(jnp.dot(p.astype(bf16), vh.astype(bf16),
                                 preferred_element_type=f32))  # (N, HD)

        head_cat = jnp.concatenate(heads, axis=-1)           # cheap lane concat -> (N, D)

        # ---- single output projection -----------------------------------------
        attn = mm(head_cat, w_ref[wb + W_WO_OFF: wb + W_WO_OFF + D, 0:D]) \
             + p_ref[vb + 1: vb + 2, 0:D]

        # ---- residual + LayerNorm1 (f32) ---------------------------------------
        y = x + attn
        mu = jnp.mean(y, axis=-1, keepdims=True)
        var = jnp.mean((y - mu) ** 2, axis=-1, keepdims=True)
        y = (y - mu) * jax.lax.rsqrt(var + EPS_LN) \
            * p_ref[vb + 4: vb + 5, 0:D] + p_ref[vb + 5: vb + 6, 0:D]

        # ---- feed-forward (Linear -> relu -> Linear) -----------------------------
        h1 = mm(y, w_ref[wb + W_W1_OFF: wb + W_W1_OFF + D, 0:HIDDEN]) \
           + p_ref[vb + 2: vb + 3, 0:HIDDEN]
        h1 = jnp.maximum(h1, 0.0)
        ff = mm(h1, w_ref[wb + W_W2_OFF: wb + W_W2_OFF + HIDDEN, 0:D]) \
           + p_ref[vb + 3: vb + 4, 0:D]

        # ---- residual + LayerNorm2 (f32) ---------------------------------------
        z = y + ff
        mu2 = jnp.mean(z, axis=-1, keepdims=True)
        var2 = jnp.mean((z - mu2) ** 2, axis=-1, keepdims=True)
        x = (z - mu2) * jax.lax.rsqrt(var2 + EPS_LN) \
            * p_ref[vb + 6: vb + 7, 0:D] + p_ref[vb + 7: vb + 8, 0:D]

    # ---- BatchNorm1d(eval) folded affine -> relu (dropout = identity) ------------
    s_bn = jnp.maximum(
        x * p_ref[V_HEAD_BASE + 0: V_HEAD_BASE + 1, 0:D]
          + p_ref[V_HEAD_BASE + 1: V_HEAD_BASE + 2, 0:D], 0.0)

    # ---- fused heads: one (N,D)@(D,D+1) matmul gives [fc3 logits | fc4 value] ----
    out = mm(s_bn, w_ref[W_HEAD_BASE: W_HEAD_BASE + D, 0:D + 1]) \
        + p_ref[V_HEAD_BASE + 2: V_HEAD_BASE + 3, 0:D + 1]    # (N, D+1)

    logits = out[:, 0:D]
    vhead = out[:, D:D + 1]

    m = jnp.max(logits, axis=-1, keepdims=True)
    lse = jnp.log(jnp.sum(jnp.exp(logits - m), axis=-1, keepdims=True)) + m
    log_pi = logits - lse                                     # exact log_softmax
    v_tanh = jnp.tanh(vhead)

    # lane-dense (N, 128) store: log_pi in lanes 0..D-1, v in lane D, zeros elsewhere
    pad = jnp.zeros((n, OUT_LANES - (D + 1)), f32)
    out_ref[...] = jnp.concatenate([log_pi, v_tanh, pad], axis=-1).astype(out_ref.dtype)


# ----------------------------------------------------------------------------
# Wrapper: single pallas_call, no grid, everything resident in VMEM (a few KB)
# ----------------------------------------------------------------------------
@jax.jit
def my_encoder_net_forward(s, w_slab, p_slab):
    x = s.reshape(-1, D).astype(jnp.float32)        # s.view(-1, board_size)
    n = x.shape[0]
    out = pl.pallas_call(
        fused_forward_kernel,
        out_shape=jax.ShapeDtypeStruct((n, OUT_LANES), jnp.float32),
        in_specs=[pl.BlockSpec(memory_space=pltpu.MemorySpace.VMEM)] * 3,
        out_specs=pl.BlockSpec(memory_space=pltpu.MemorySpace.VMEM),
    )(x, w_slab, p_slab)
    return out[:, 0:D], out[:, D:D + 1]             # (log_pi, v)


# ----------------------------------------------------------------------------
# Deterministic PyTorch-style parameter init
# ----------------------------------------------------------------------------
def init_torch_style_params(key):
    def nrm(k, shape, scale=0.1):
        return jax.random.normal(k, shape, dtype=jnp.float32) * scale

    layers = []
    for _ in range(NUM_BLOCKS):
        key, *ks = jax.random.split(key, 9)
        layers.append(dict(
            in_proj_weight=nrm(ks[0], (3 * D, D)),
            in_proj_bias=nrm(ks[1], (3 * D,), 0.01),
            out_proj_weight=nrm(ks[2], (D, D)),
            out_proj_bias=nrm(ks[3], (D,), 0.01),
            linear1_weight=nrm(ks[4], (HIDDEN, D)),
            linear1_bias=nrm(ks[5], (HIDDEN,), 0.01),
            linear2_weight=nrm(ks[6], (D, HIDDEN)),
            linear2_bias=nrm(ks[7], (D,), 0.01),
            norm1_weight=jnp.ones((D,), jnp.float32),
            norm1_bias=jnp.zeros((D,), jnp.float32),
            norm2_weight=jnp.ones((D,), jnp.float32),
            norm2_bias=jnp.zeros((D,), jnp.float32),
        ))

    key, k3, k4 = jax.random.split(key, 3)
    head = dict(
        bn_weight=jnp.ones((D,), jnp.float32),
        bn_bias=jnp.zeros((D,), jnp.float32),
        bn_mean=jnp.zeros((D,), jnp.float32),
        bn_var=jnp.ones((D,), jnp.float32),
        fc3_weight=nrm(k3, (D, D)),
        fc3_bias=jnp.zeros((D,), jnp.float32),
        fc4_weight=nrm(k4, (1, D)),
        fc4_bias=jnp.zeros((1,), jnp.float32),
    )
    return layers, head


# ----------------------------------------------------------------------------
# Pack ALL parameters into two lane-dense slabs (done once, outside the kernel):
#   w_slab (bf16): pre-transposed matmul weights, attention scale folded into Q,
#                  fc3|fc4 fused.          shape (W_ROWS, 128)
#   p_slab (f32) : biases / LN params / BN(eval) folded affine.  shape (V_ROWS, 128)
# ----------------------------------------------------------------------------
def pack_params(layers, head):
    scale = 1.0 / (HEAD_DIM ** 0.5)

    w_slab = jnp.zeros((W_ROWS, 128), jnp.float32)
    p_slab = jnp.zeros((V_ROWS, 128), jnp.float32)

    for l, lp in enumerate(layers):
        W, B = lp["in_proj_weight"], lp["in_proj_bias"]        # (3D, D), (3D,)
        wqkv_t = jnp.concatenate(
            [W[:D].T * scale, W[D:2 * D].T, W[2 * D:].T], axis=1)     # (D, 3D)
        bqkv = jnp.concatenate([B[:D] * scale, B[D:2 * D], B[2 * D:]])  # (3D,)

        wb = l * W_ROWS_PER_LAYER
        w_slab = w_slab.at[wb + W_QKV_OFF: wb + W_QKV_OFF + D, 0:3 * D].set(wqkv_t)
        w_slab = w_slab.at[wb + W_WO_OFF: wb + W_WO_OFF + D, 0:D].set(
            lp["out_proj_weight"].T)
        w_slab = w_slab.at[wb + W_W1_OFF: wb + W_W1_OFF + D, 0:HIDDEN].set(
            lp["linear1_weight"].T)
        w_slab = w_slab.at[wb + W_W2_OFF: wb + W_W2_OFF + HIDDEN, 0:D].set(
            lp["linear2_weight"].T)

        vb = l * V_ROWS_PER_LAYER
        p_slab = p_slab.at[vb + 0, 0:3 * D].set(bqkv)
        p_slab = p_slab.at[vb + 1, 0:D].set(lp["out_proj_bias"])
        p_slab = p_slab.at[vb + 2, 0:HIDDEN].set(lp["linear1_bias"])
        p_slab = p_slab.at[vb + 3, 0:D].set(lp["linear2_bias"])
        p_slab = p_slab.at[vb + 4, 0:D].set(lp["norm1_weight"])
        p_slab = p_slab.at[vb + 5, 0:D].set(lp["norm1_bias"])
        p_slab = p_slab.at[vb + 6, 0:D].set(lp["norm2_weight"])
        p_slab = p_slab.at[vb + 7, 0:D].set(lp["norm2_bias"])

    # BatchNorm1d (eval) folded into a single affine transform
    bn_scale = head["bn_weight"] * jax.lax.rsqrt(head["bn_var"] + EPS_BN)
    bn_bias = head["bn_bias"] - head["bn_mean"] * bn_scale

    # fused fc3 | fc4
    w34_t = jnp.concatenate([head["fc3_weight"].T, head["fc4_weight"].T], axis=1)  # (D, D+1)
    b34 = jnp.concatenate([head["fc3_bias"], head["fc4_bias"]])                    # (D+1,)

    w_slab = w_slab.at[W_HEAD_BASE: W_HEAD_BASE + D, 0:D + 1].set(w34_t)
    p_slab = p_slab.at[V_HEAD_BASE + 0, 0:D].set(bn_scale)
    p_slab = p_slab.at[V_HEAD_BASE + 1, 0:D].set(bn_bias)
    p_slab = p_slab.at[V_HEAD_BASE + 2, 0:D + 1].set(b34)

    return w_slab.astype(jnp.bfloat16), p_slab


if __name__ == "__main__":
    key = jax.random.PRNGKey(0)
    key, pkey, xkey = jax.random.split(key, 3)

    layers, head = init_torch_style_params(pkey)
    w_slab, p_slab = pack_params(layers, head)

    # input: (2, 4, 16) -> view(-1, 16) -> (8, 16)
    s = jax.random.normal(xkey, (2, 4, D), dtype=jnp.float32)

    log_pi, v = my_encoder_net_forward(s, w_slab, p_slab)
    jax.block_until_ready((log_pi, v))

    n_rows = 2 * 4
    assert log_pi.shape == (n_rows, D) and v.shape == (n_rows, 1)
    assert bool(jnp.all(jnp.isfinite(log_pi))) and bool(jnp.all(jnp.isfinite(v)))
    # log_softmax rows must exponentiate-sum to ~1
    assert bool(jnp.allclose(jnp.sum(jnp.exp(log_pi), axis=1), 1.0, atol=1e-3))
    assert bool(jnp.all(jnp.abs(v) <= 1.0))
    print("KERNEL_OK")
</pallas_src>

<mosaic_0001>
module attributes {stable_mosaic.version = 11 : i64} {
  func.func @fused_forward_kernel(%arg0: memref<8x16xf32, #tpu.memory_space<vmem>>, %arg1: memref<176x128xbf16, #tpu.memory_space<vmem>>, %arg2: memref<24x128xf32, #tpu.memory_space<vmem>>, %arg3: memref<8x128xf32, #tpu.memory_space<vmem>>) attributes {dimension_semantics = [], scalar_prefetch = 0 : i64, scratch_operands = 0 : i64, tpu.core_type = #tpu.core_type<tc>} {
    %c0 = arith.constant 0 : index
    %c0_0 = arith.constant 0 : index
    %0 = vector.load %arg0[%c0, %c0_0] : memref<8x16xf32, #tpu.memory_space<vmem>>, vector<8x16xf32>
    %c0_1 = arith.constant 0 : index
    %c0_2 = arith.constant 0 : index
    %1 = vector.load %arg1[%c0_1, %c0_2] : memref<176x128xbf16, #tpu.memory_space<vmem>>, vector<16x48xbf16>
    %2 = arith.truncf %0 : vector<8x16xf32> to vector<8x16xbf16>
    %cst = arith.constant dense<0.000000e+00> : vector<8x48xf32>
    %3 = tpu.matmul %2, %1, %cst {dimension_numbers = #tpu.dot_dimension_numbers<[1], [0], [0], [1], [0, 0, 1, 1], [], []>} : vector<8x16xbf16>, vector<16x48xbf16>, vector<8x48xf32> -> vector<8x48xf32>
    %c0_3 = arith.constant 0 : index
    %c0_4 = arith.constant 0 : index
    %4 = vector.load %arg2[%c0_3, %c0_4] : memref<24x128xf32, #tpu.memory_space<vmem>>, vector<1x48xf32>
    %5 = vector.broadcast %4 : vector<1x48xf32> to vector<8x48xf32>
    %6 = arith.addf %3, %5 : vector<8x48xf32>
    %7 = vector.extract_strided_slice %6 {offsets = [0, 0], sizes = [8, 8], strides = [1, 1]} : vector<8x48xf32> to vector<8x8xf32>
    %8 = vector.extract_strided_slice %6 {offsets = [0, 16], sizes = [8, 8], strides = [1, 1]} : vector<8x48xf32> to vector<8x8xf32>
    %9 = vector.extract_strided_slice %6 {offsets = [0, 32], sizes = [8, 8], strides = [1, 1]} : vector<8x48xf32> to vector<8x8xf32>
    %10 = arith.truncf %7 : vector<8x8xf32> to vector<8x8xbf16>
    %11 = arith.truncf %8 : vector<8x8xf32> to vector<8x8xbf16>
    %cst_5 = arith.constant dense<0.000000e+00> : vector<8x8xf32>
    %12 = tpu.matmul %10, %11, %cst_5 {dimension_numbers = #tpu.dot_dimension_numbers<[1], [1], [0], [0], [0, 0, 1, 0], [], []>} : vector<8x8xbf16>, vector<8x8xbf16>, vector<8x8xf32> -> vector<8x8xf32>
    %cst_6 = arith.constant dense<0xFF800000> : vector<8xf32>
    %13 = vector.multi_reduction <maximumf>, %12, %cst_6 [1] : vector<8x8xf32> to vector<8xf32>
    %14 = vector.shape_cast %13 : vector<8xf32> to vector<8x1xf32>
    %15 = vector.broadcast %14 : vector<8x1xf32> to vector<8x8xf32>
    %16 = arith.subf %12, %15 : vector<8x8xf32>
    %17 = math.exp %16 : vector<8x8xf32>
    %cst_7 = arith.constant dense<0.000000e+00> : vector<8xf32>
    %18 = vector.multi_reduction <add>, %17, %cst_7 [1] : vector<8x8xf32> to vector<8xf32>
    %19 = vector.shape_cast %18 : vector<8xf32> to vector<8x1xf32>
    %20 = vector.broadcast %19 : vector<8x1xf32> to vector<8x8xf32>
    %21 = arith.divf %17, %20 : vector<8x8xf32>
    %22 = arith.truncf %21 : vector<8x8xf32> to vector<8x8xbf16>
    %23 = arith.truncf %9 : vector<8x8xf32> to vector<8x8xbf16>
    %cst_8 = arith.constant dense<0.000000e+00> : vector<8x8xf32>
    %24 = tpu.matmul %22, %23, %cst_8 {dimension_numbers = #tpu.dot_dimension_numbers<[1], [0], [0], [1], [0, 0, 1, 1], [], []>} : vector<8x8xbf16>, vector<8x8xbf16>, vector<8x8xf32> -> vector<8x8xf32>
    %25 = vector.extract_strided_slice %6 {offsets = [0, 8], sizes = [8, 8], strides = [1, 1]} : vector<8x48xf32> to vector<8x8xf32>
    %26 = vector.extract_strided_slice %6 {offsets = [0, 24], sizes = [8, 8], strides = [1, 1]} : vector<8x48xf32> to vector<8x8xf32>
    %27 = vector.extract_strided_slice %6 {offsets = [0, 40], sizes = [8, 8], strides = [1, 1]} : vector<8x48xf32> to vector<8x8xf32>
    %28 = arith.truncf %25 : vector<8x8xf32> to vector<8x8xbf16>
    %29 = arith.truncf %26 : vector<8x8xf32> to vector<8x8xbf16>
    %cst_9 = arith.constant dense<0.000000e+00> : vector<8x8xf32>
    %30 = tpu.matmul %28, %29, %cst_9 {dimension_numbers = #tpu.dot_dimension_numbers<[1], [1], [0], [0], [0, 0, 1, 0], [], []>} : vector<8x8xbf16>, vector<8x8xbf16>, vector<8x8xf32> -> vector<8x8xf32>
    %cst_10 = arith.constant dense<0xFF800000> : vector<8xf32>
    %31 = vector.multi_reduction <maximumf>, %30, %cst_10 [1] : vector<8x8xf32> to vector<8xf32>
    %32 = vector.shape_cast %31 : vector<8xf32> to vector<8x1xf32>
    %33 = vector.broadcast %32 : vector<8x1xf32> to vector<8x8xf32>
    %34 = arith.subf %30, %33 : vector<8x8xf32>
    %35 = math.exp %34 : vector<8x8xf32>
    %cst_11 = arith.constant dense<0.000000e+00> : vector<8xf32>
    %36 = vector.multi_reduction <add>, %35, %cst_11 [1] : vector<8x8xf32> to vector<8xf32>
    %37 = vector.shape_cast %36 : vector<8xf32> to vector<8x1xf32>
    %38 = vector.broadcast %37 : vector<8x1xf32> to vector<8x8xf32>
    %39 = arith.divf %35, %38 : vector<8x8xf32>
    %40 = arith.truncf %39 : vector<8x8xf32> to vector<8x8xbf16>
    %41 = arith.truncf %27 : vector<8x8xf32> to vector<8x8xbf16>
    %cst_12 = arith.constant dense<0.000000e+00> : vector<8x8xf32>
    %42 = tpu.matmul %40, %41, %cst_12 {dimension_numbers = #tpu.dot_dimension_numbers<[1], [0], [0], [1], [0, 0, 1, 1], [], []>} : vector<8x8xbf16>, vector<8x8xbf16>, vector<8x8xf32> -> vector<8x8xf32>
    %43 = tpu.concatenate %24, %42 in 1 : vector<8x8xf32>, vector<8x8xf32> -> vector<8x16xf32>
    %c16 = arith.constant 16 : index
    %c0_13 = arith.constant 0 : index
    %44 = vector.load %arg1[%c16, %c0_13] : memref<176x128xbf16, #tpu.memory_space<vmem>>, vector<16x16xbf16>
    %45 = arith.truncf %43 : vector<8x16xf32> to vector<8x16xbf16>
    %cst_14 = arith.constant dense<0.000000e+00> : vector<8x16xf32>
    %46 = tpu.matmul %45, %44, %cst_14 {dimension_numbers = #tpu.dot_dimension_numbers<[1], [0], [0], [1], [0, 0, 1, 1], [], []>} : vector<8x16xbf16>, vector<16x16xbf16>, vector<8x16xf32> -> vector<8x16xf32>
    %c1 = arith.constant 1 : index
    %c0_15 = arith.constant 0 : index
    %47 = vector.load %arg2[%c1, %c0_15] : memref<24x128xf32, #tpu.memory_space<vmem>>, vector<1x16xf32>
    %48 = vector.broadcast %47 : vector<1x16xf32> to vector<8x16xf32>
    %49 = arith.addf %46, %48 : vector<8x16xf32>
    %50 = arith.addf %0, %49 : vector<8x16xf32>
    %cst_16 = arith.constant dense<0.000000e+00> : vector<8xf32>
    %51 = vector.multi_reduction <add>, %50, %cst_16 [1] : vector<8x16xf32> to vector<8xf32>
    %52 = vector.shape_cast %51 : vector<8xf32> to vector<8x1xf32>
    %cst_17 = arith.constant 1.600000e+01 : f32
    %53 = vector.broadcast %cst_17 : f32 to vector<8x1xf32>
    %54 = arith.divf %52, %53 : vector<8x1xf32>
    %55 = vector.broadcast %54 : vector<8x1xf32> to vector<8x16xf32>
    %56 = arith.subf %50, %55 : vector<8x16xf32>
    %57 = arith.mulf %56, %56 : vector<8x16xf32>
    %cst_18 = arith.constant dense<0.000000e+00> : vector<8xf32>
    %58 = vector.multi_reduction <add>, %57, %cst_18 [1] : vector<8x16xf32> to vector<8xf32>
    %59 = vector.shape_cast %58 : vector<8xf32> to vector<8x1xf32>
    %cst_19 = arith.constant 1.600000e+01 : f32
    %60 = vector.broadcast %cst_19 : f32 to vector<8x1xf32>
    %61 = arith.divf %59, %60 : vector<8x1xf32>
    %62 = vector.broadcast %54 : vector<8x1xf32> to vector<8x16xf32>
    %63 = arith.subf %50, %62 : vector<8x16xf32>
    %cst_20 = arith.constant 9.99999974E-6 : f32
    %64 = vector.broadcast %cst_20 : f32 to vector<8x1xf32>
    %65 = arith.addf %61, %64 : vector<8x1xf32>
    %66 = math.rsqrt %65 : vector<8x1xf32>
    %67 = vector.broadcast %66 : vector<8x1xf32> to vector<8x16xf32>
    %68 = arith.mulf %63, %67 : vector<8x16xf32>
    %c4 = arith.constant 4 : index
    %c0_21 = arith.constant 0 : index
    %69 = vector.load %arg2[%c4, %c0_21] : memref<24x128xf32, #tpu.memory_space<vmem>>, vector<1x16xf32>
    %70 = vector.broadcast %69 : vector<1x16xf32> to vector<8x16xf32>
    %71 = arith.mulf %68, %70 : vector<8x16xf32>
    %c5 = arith.constant 5 : index
    %c0_22 = arith.constant 0 : index
    %72 = vector.load %arg2[%c5, %c0_22] : memref<24x128xf32, #tpu.memory_space<vmem>>, vector<1x16xf32>
    %73 = vector.broadcast %72 : vector<1x16xf32> to vector<8x16xf32>
    %74 = arith.addf %71, %73 : vector<8x16xf32>
    %c32 = arith.constant 32 : index
    %c0_23 = arith.constant 0 : index
    %75 = vector.load %arg1[%c32, %c0_23] : memref<176x128xbf16, #tpu.memory_space<vmem>>, vector<16x32xbf16>
    %76 = arith.truncf %74 : vector<8x16xf32> to vector<8x16xbf16>
    %cst_24 = arith.constant dense<0.000000e+00> : vector<8x32xf32>
    %77 = tpu.matmul %76, %75, %cst_24 {dimension_numbers = #tpu.dot_dimension_numbers<[1], [0], [0], [1], [0, 0, 1, 1], [], []>} : vector<8x16xbf16>, vector<16x32xbf16>, vector<8x32xf32> -> vector<8x32xf32>
    %c2 = arith.constant 2 : index
    %c0_25 = arith.constant 0 : index
    %78 = vector.load %arg2[%c2, %c0_25] : memref<24x128xf32, #tpu.memory_space<vmem>>, vector<1x32xf32>
    %79 = vector.broadcast %78 : vector<1x32xf32> to vector<8x32xf32>
    %80 = arith.addf %77, %79 : vector<8x32xf32>
    %cst_26 = arith.constant 0.000000e+00 : f32
    %81 = vector.broadcast %cst_26 : f32 to vector<8x32xf32>
    %82 = arith.maximumf %80, %81 : vector<8x32xf32>
    %c48 = arith.constant 48 : index
    %c0_27 = arith.constant 0 : index
    %83 = vector.load %arg1[%c48, %c0_27] : memref<176x128xbf16, #tpu.memory_space<vmem>>, vector<32x16xbf16>
    %84 = arith.truncf %82 : vector<8x32xf32> to vector<8x32xbf16>
    %cst_28 = arith.constant dense<0.000000e+00> : vector<8x16xf32>
    %85 = tpu.matmul %84, %83, %cst_28 {dimension_numbers = #tpu.dot_dimension_numbers<[1], [0], [0], [1], [0, 0, 1, 1], [], []>} : vector<8x32xbf16>, vector<32x16xbf16>, vector<8x16xf32> -> vector<8x16xf32>
    %c3 = arith.constant 3 : index
    %c0_29 = arith.constant 0 : index
    %86 = vector.load %arg2[%c3, %c0_29] : memref<24x128xf32, #tpu.memory_space<vmem>>, vector<1x16xf32>
    %87 = vector.broadcast %86 : vector<1x16xf32> to vector<8x16xf32>
    %88 = arith.addf %85, %87 : vector<8x16xf32>
    %89 = arith.addf %74, %88 : vector<8x16xf32>
    %cst_30 = arith.constant dense<0.000000e+00> : vector<8xf32>
    %90 = vector.multi_reduction <add>, %89, %cst_30 [1] : vector<8x16xf32> to vector<8xf32>
    %91 = vector.shape_cast %90 : vector<8xf32> to vector<8x1xf32>
    %cst_31 = arith.constant 1.600000e+01 : f32
    %92 = vector.broadcast %cst_31 : f32 to vector<8x1xf32>
    %93 = arith.divf %91, %92 : vector<8x1xf32>
    %94 = vector.broadcast %93 : vector<8x1xf32> to vector<8x16xf32>
    %95 = arith.subf %89, %94 : vector<8x16xf32>
    %96 = arith.mulf %95, %95 : vector<8x16xf32>
    %cst_32 = arith.constant dense<0.000000e+00> : vector<8xf32>
    %97 = vector.multi_reduction <add>, %96, %cst_32 [1] : vector<8x16xf32> to vector<8xf32>
    %98 = vector.shape_cast %97 : vector<8xf32> to vector<8x1xf32>
    %cst_33 = arith.constant 1.600000e+01 : f32
    %99 = vector.broadcast %cst_33 : f32 to vector<8x1xf32>
    %100 = arith.divf %98, %99 : vector<8x1xf32>
    %101 = vector.broadcast %93 : vector<8x1xf32> to vector<8x16xf32>
    %102 = arith.subf %89, %101 : vector<8x16xf32>
    %cst_34 = arith.constant 9.99999974E-6 : f32
    %103 = vector.broadcast %cst_34 : f32 to vector<8x1xf32>
    %104 = arith.addf %100, %103 : vector<8x1xf32>
    %105 = math.rsqrt %104 : vector<8x1xf32>
    %106 = vector.broadcast %105 : vector<8x1xf32> to vector<8x16xf32>
    %107 = arith.mulf %102, %106 : vector<8x16xf32>
    %c6 = arith.constant 6 : index
    %c0_35 = arith.constant 0 : index
    %108 = vector.load %arg2[%c6, %c0_35] : memref<24x128xf32, #tpu.memory_space<vmem>>, vector<1x16xf32>
    %109 = vector.broadcast %108 : vector<1x16xf32> to vector<8x16xf32>
    %110 = arith.mulf %107, %109 : vector<8x16xf32>
    %c7 = arith.constant 7 : index
    %c0_36 = arith.constant 0 : index
    %111 = vector.load %arg2[%c7, %c0_36] : memref<24x128xf32, #tpu.memory_space<vmem>>, vector<1x16xf32>
    %112 = vector.broadcast %111 : vector<1x16xf32> to vector<8x16xf32>
    %113 = arith.addf %110, %112 : vector<8x16xf32>
    %c80 = arith.constant 80 : index
    %c0_37 = arith.constant 0 : index
    %114 = vector.load %arg1[%c80, %c0_37] : memref<176x128xbf16, #tpu.memory_space<vmem>>, vector<16x48xbf16>
    %115 = arith.truncf %113 : vector<8x16xf32> to vector<8x16xbf16>
    %cst_38 = arith.constant dense<0.000000e+00> : vector<8x48xf32>
    %116 = tpu.matmul %115, %114, %cst_38 {dimension_numbers = #tpu.dot_dimension_numbers<[1], [0], [0], [1], [0, 0, 1, 1], [], []>} : vector<8x16xbf16>, vector<16x48xbf16>, vector<8x48xf32> -> vector<8x48xf32>
    %c8 = arith.constant 8 : index
    %c0_39 = arith.constant 0 : index
    %117 = vector.load %arg2[%c8, %c0_39] : memref<24x128xf32, #tpu.memory_space<vmem>>, vector<1x48xf32>
    %118 = vector.broadcast %117 : vector<1x48xf32> to vector<8x48xf32>
    %119 = arith.addf %116, %118 : vector<8x48xf32>
    %120 = vector.extract_strided_slice %119 {offsets = [0, 0], sizes = [8, 8], strides = [1, 1]} : vector<8x48xf32> to vector<8x8xf32>
    %121 = vector.extract_strided_slice %119 {offsets = [0, 16], sizes = [8, 8], strides = [1, 1]} : vector<8x48xf32> to vector<8x8xf32>
    %122 = vector.extract_strided_slice %119 {offsets = [0, 32], sizes = [8, 8], strides = [1, 1]} : vector<8x48xf32> to vector<8x8xf32>
    %123 = arith.truncf %120 : vector<8x8xf32> to vector<8x8xbf16>
    %124 = arith.truncf %121 : vector<8x8xf32> to vector<8x8xbf16>
    %cst_40 = arith.constant dense<0.000000e+00> : vector<8x8xf32>
    %125 = tpu.matmul %123, %124, %cst_40 {dimension_numbers = #tpu.dot_dimension_numbers<[1], [1], [0], [0], [0, 0, 1, 0], [], []>} : vector<8x8xbf16>, vector<8x8xbf16>, vector<8x8xf32> -> vector<8x8xf32>
    %cst_41 = arith.constant dense<0xFF800000> : vector<8xf32>
    %126 = vector.multi_reduction <maximumf>, %125, %cst_41 [1] : vector<8x8xf32> to vector<8xf32>
    %127 = vector.shape_cast %126 : vector<8xf32> to vector<8x1xf32>
    %128 = vector.broadcast %127 : vector<8x1xf32> to vector<8x8xf32>
    %129 = arith.subf %125, %128 : vector<8x8xf32>
    %130 = math.exp %129 : vector<8x8xf32>
    %cst_42 = arith.constant dense<0.000000e+00> : vector<8xf32>
    %131 = vector.multi_reduction <add>, %130, %cst_42 [1] : vector<8x8xf32> to vector<8xf32>
    %132 = vector.shape_cast %131 : vector<8xf32> to vector<8x1xf32>
    %133 = vector.broadcast %132 : vector<8x1xf32> to vector<8x8xf32>
    %134 = arith.divf %130, %133 : vector<8x8xf32>
    %135 = arith.truncf %134 : vector<8x8xf32> to vector<8x8xbf16>
    %136 = arith.truncf %122 : vector<8x8xf32> to vector<8x8xbf16>
    %cst_43 = arith.constant dense<0.000000e+00> : vector<8x8xf32>
    %137 = tpu.matmul %135, %136, %cst_43 {dimension_numbers = #tpu.dot_dimension_numbers<[1], [0], [0], [1], [0, 0, 1, 1], [], []>} : vector<8x8xbf16>, vector<8x8xbf16>, vector<8x8xf32> -> vector<8x8xf32>
    %138 = vector.extract_strided_slice %119 {offsets = [0, 8], sizes = [8, 8], strides = [1, 1]} : vector<8x48xf32> to vector<8x8xf32>
    %139 = vector.extract_strided_slice %119 {offsets = [0, 24], sizes = [8, 8], strides = [1, 1]} : vector<8x48xf32> to vector<8x8xf32>
    %140 = vector.extract_strided_slice %119 {offsets = [0, 40], sizes = [8, 8], strides = [1, 1]} : vector<8x48xf32> to vector<8x8xf32>
    %141 = arith.truncf %138 : vector<8x8xf32> to vector<8x8xbf16>
    %142 = arith.truncf %139 : vector<8x8xf32> to vector<8x8xbf16>
    %cst_44 = arith.constant dense<0.000000e+00> : vector<8x8xf32>
    %143 = tpu.matmul %141, %142, %cst_44 {dimension_numbers = #tpu.dot_dimension_numbers<[1], [1], [0], [0], [0, 0, 1, 0], [], []>} : vector<8x8xbf16>, vector<8x8xbf16>, vector<8x8xf32> -> vector<8x8xf32>
    %cst_45 = arith.constant dense<0xFF800000> : vector<8xf32>
    %144 = vector.multi_reduction <maximumf>, %143, %cst_45 [1] : vector<8x8xf32> to vector<8xf32>
    %145 = vector.shape_cast %144 : vector<8xf32> to vector<8x1xf32>
    %146 = vector.broadcast %145 : vector<8x1xf32> to vector<8x8xf32>
    %147 = arith.subf %143, %146 : vector<8x8xf32>
    %148 = math.exp %147 : vector<8x8xf32>
    %cst_46 = arith.constant dense<0.000000e+00> : vector<8xf32>
    %149 = vector.multi_reduction <add>, %148, %cst_46 [1] : vector<8x8xf32> to vector<8xf32>
    %150 = vector.shape_cast %149 : vector<8xf32> to vector<8x1xf32>
    %151 = vector.broadcast %150 : vector<8x1xf32> to vector<8x8xf32>
    %152 = arith.divf %148, %151 : vector<8x8xf32>
    %153 = arith.truncf %152 : vector<8x8xf32> to vector<8x8xbf16>
    %154 = arith.truncf %140 : vector<8x8xf32> to vector<8x8xbf16>
    %cst_47 = arith.constant dense<0.000000e+00> : vector<8x8xf32>
    %155 = tpu.matmul %153, %154, %cst_47 {dimension_numbers = #tpu.dot_dimension_numbers<[1], [0], [0], [1], [0, 0, 1, 1], [], []>} : vector<8x8xbf16>, vector<8x8xbf16>, vector<8x8xf32> -> vector<8x8xf32>
    %156 = tpu.concatenate %137, %155 in 1 : vector<8x8xf32>, vector<8x8xf32> -> vector<8x16xf32>
    %c96 = arith.constant 96 : index
    %c0_48 = arith.constant 0 : index
    %157 = vector.load %arg1[%c96, %c0_48] : memref<176x128xbf16, #tpu.memory_space<vmem>>, vector<16x16xbf16>
    %158 = arith.truncf %156 : vector<8x16xf32> to vector<8x16xbf16>
    %cst_49 = arith.constant dense<0.000000e+00> : vector<8x16xf32>
    %159 = tpu.matmul %158, %157, %cst_49 {dimension_numbers = #tpu.dot_dimension_numbers<[1], [0], [0], [1], [0, 0, 1, 1], [], []>} : vector<8x16xbf16>, vector<16x16xbf16>, vector<8x16xf32> -> vector<8x16xf32>
    %c9 = arith.constant 9 : index
    %c0_50 = arith.constant 0 : index
    %160 = vector.load %arg2[%c9, %c0_50] : memref<24x128xf32, #tpu.memory_space<vmem>>, vector<1x16xf32>
    %161 = vector.broadcast %160 : vector<1x16xf32> to vector<8x16xf32>
    %162 = arith.addf %159, %161 : vector<8x16xf32>
    %163 = arith.addf %113, %162 : vector<8x16xf32>
    %cst_51 = arith.constant dense<0.000000e+00> : vector<8xf32>
    %164 = vector.multi_reduction <add>, %163, %cst_51 [1] : vector<8x16xf32> to vector<8xf32>
    %165 = vector.shape_cast %164 : vector<8xf32> to vector<8x1xf32>
    %cst_52 = arith.constant 1.600000e+01 : f32
    %166 = vector.broadcast %cst_52 : f32 to vector<8x1xf32>
    %167 = arith.divf %165, %166 : vector<8x1xf32>
    %168 = vector.broadcast %167 : vector<8x1xf32> to vector<8x16xf32>
    %169 = arith.subf %163, %168 : vector<8x16xf32>
    %170 = arith.mulf %169, %169 : vector<8x16xf32>
    %cst_53 = arith.constant dense<0.000000e+00> : vector<8xf32>
    %171 = vector.multi_reduction <add>, %170, %cst_53 [1] : vector<8x16xf32> to vector<8xf32>
    %172 = vector.shape_cast %171 : vector<8xf32> to vector<8x1xf32>
    %cst_54 = arith.constant 1.600000e+01 : f32
    %173 = vector.broadcast %cst_54 : f32 to vector<8x1xf32>
    %174 = arith.divf %172, %173 : vector<8x1xf32>
    %175 = vector.broadcast %167 : vector<8x1xf32> to vector<8x16xf32>
    %176 = arith.subf %163, %175 : vector<8x16xf32>
    %cst_55 = arith.constant 9.99999974E-6 : f32
    %177 = vector.broadcast %cst_55 : f32 to vector<8x1xf32>
    %178 = arith.addf %174, %177 : vector<8x1xf32>
    %179 = math.rsqrt %178 : vector<8x1xf32>
    %180 = vector.broadcast %179 : vector<8x1xf32> to vector<8x16xf32>
    %181 = arith.mulf %176, %180 : vector<8x16xf32>
    %c12 = arith.constant 12 : index
    %c0_56 = arith.constant 0 : index
    %182 = vector.load %arg2[%c12, %c0_56] : memref<24x128xf32, #tpu.memory_space<vmem>>, vector<1x16xf32>
    %183 = vector.broadcast %182 : vector<1x16xf32> to vector<8x16xf32>
    %184 = arith.mulf %181, %183 : vector<8x16xf32>
    %c13 = arith.constant 13 : index
    %c0_57 = arith.constant 0 : index
    %185 = vector.load %arg2[%c13, %c0_57] : memref<24x128xf32, #tpu.memory_space<vmem>>, vector<1x16xf32>
    %186 = vector.broadcast %185 : vector<1x16xf32> to vector<8x16xf32>
    %187 = arith.addf %184, %186 : vector<8x16xf32>
    %c112 = arith.constant 112 : index
    %c0_58 = arith.constant 0 : index
    %188 = vector.load %arg1[%c112, %c0_58] : memref<176x128xbf16, #tpu.memory_space<vmem>>, vector<16x32xbf16>
    %189 = arith.truncf %187 : vector<8x16xf32> to vector<8x16xbf16>
    %cst_59 = arith.constant dense<0.000000e+00> : vector<8x32xf32>
    %190 = tpu.matmul %189, %188, %cst_59 {dimension_numbers = #tpu.dot_dimension_numbers<[1], [0], [0], [1], [0, 0, 1, 1], [], []>} : vector<8x16xbf16>, vector<16x32xbf16>, vector<8x32xf32> -> vector<8x32xf32>
    %c10 = arith.constant 10 : index
    %c0_60 = arith.constant 0 : index
    %191 = vector.load %arg2[%c10, %c0_60] : memref<24x128xf32, #tpu.memory_space<vmem>>, vector<1x32xf32>
    %192 = vector.broadcast %191 : vector<1x32xf32> to vector<8x32xf32>
    %193 = arith.addf %190, %192 : vector<8x32xf32>
    %cst_61 = arith.constant 0.000000e+00 : f32
    %194 = vector.broadcast %cst_61 : f32 to vector<8x32xf32>
    %195 = arith.maximumf %193, %194 : vector<8x32xf32>
    %c128 = arith.constant 128 : index
    %c0_62 = arith.constant 0 : index
    %196 = vector.load %arg1[%c128, %c0_62] : memref<176x128xbf16, #tpu.memory_space<vmem>>, vector<32x16xbf16>
    %197 = arith.truncf %195 : vector<8x32xf32> to vector<8x32xbf16>
    %cst_63 = arith.constant dense<0.000000e+00> : vector<8x16xf32>
    %198 = tpu.matmul %197, %196, %cst_63 {dimension_numbers = #tpu.dot_dimension_numbers<[1], [0], [0], [1], [0, 0, 1, 1], [], []>} : vector<8x32xbf16>, vector<32x16xbf16>, vector<8x16xf32> -> vector<8x16xf32>
    %c11 = arith.constant 11 : index
    %c0_64 = arith.constant 0 : index
    %199 = vector.load %arg2[%c11, %c0_64] : memref<24x128xf32, #tpu.memory_space<vmem>>, vector<1x16xf32>
    %200 = vector.broadcast %199 : vector<1x16xf32> to vector<8x16xf32>
    %201 = arith.addf %198, %200 : vector<8x16xf32>
    %202 = arith.addf %187, %201 : vector<8x16xf32>
    %cst_65 = arith.constant dense<0.000000e+00> : vector<8xf32>
    %203 = vector.multi_reduction <add>, %202, %cst_65 [1] : vector<8x16xf32> to vector<8xf32>
    %204 = vector.shape_cast %203 : vector<8xf32> to vector<8x1xf32>
    %cst_66 = arith.constant 1.600000e+01 : f32
    %205 = vector.broadcast %cst_66 : f32 to vector<8x1xf32>
    %206 = arith.divf %204, %205 : vector<8x1xf32>
    %207 = vector.broadcast %206 : vector<8x1xf32> to vector<8x16xf32>
    %208 = arith.subf %202, %207 : vector<8x16xf32>
    %209 = arith.mulf %208, %208 : vector<8x16xf32>
    %cst_67 = arith.constant dense<0.000000e+00> : vector<8xf32>
    %210 = vector.multi_reduction <add>, %209, %cst_67 [1] : vector<8x16xf32> to vector<8xf32>
    %211 = vector.shape_cast %210 : vector<8xf32> to vector<8x1xf32>
    %cst_68 = arith.constant 1.600000e+01 : f32
    %212 = vector.broadcast %cst_68 : f32 to vector<8x1xf32>
    %213 = arith.divf %211, %212 : vector<8x1xf32>
    %214 = vector.broadcast %206 : vector<8x1xf32> to vector<8x16xf32>
    %215 = arith.subf %202, %214 : vector<8x16xf32>
    %cst_69 = arith.constant 9.99999974E-6 : f32
    %216 = vector.broadcast %cst_69 : f32 to vector<8x1xf32>
    %217 = arith.addf %213, %216 : vector<8x1xf32>
    %218 = math.rsqrt %217 : vector<8x1xf32>
    %219 = vector.broadcast %218 : vector<8x1xf32> to vector<8x16xf32>
    %220 = arith.mulf %215, %219 : vector<8x16xf32>
    %c14 = arith.constant 14 : index
    %c0_70 = arith.constant 0 : index
    %221 = vector.load %arg2[%c14, %c0_70] : memref<24x128xf32, #tpu.memory_space<vmem>>, vector<1x16xf32>
    %222 = vector.broadcast %221 : vector<1x16xf32> to vector<8x16xf32>
    %223 = arith.mulf %220, %222 : vector<8x16xf32>
    %c15 = arith.constant 15 : index
    %c0_71 = arith.constant 0 : index
    %224 = vector.load %arg2[%c15, %c0_71] : memref<24x128xf32, #tpu.memory_space<vmem>>, vector<1x16xf32>
    %225 = vector.broadcast %224 : vector<1x16xf32> to vector<8x16xf32>
    %226 = arith.addf %223, %225 : vector<8x16xf32>
    %c16_72 = arith.constant 16 : index
    %c0_73 = arith.constant 0 : index
    %227 = vector.load %arg2[%c16_72, %c0_73] : memref<24x128xf32, #tpu.memory_space<vmem>>, vector<1x16xf32>
    %228 = vector.broadcast %227 : vector<1x16xf32> to vector<8x16xf32>
    %229 = arith.mulf %226, %228 : vector<8x16xf32>
    %c17 = arith.constant 17 : index
    %c0_74 = arith.constant 0 : index
    %230 = vector.load %arg2[%c17, %c0_74] : memref<24x128xf32, #tpu.memory_space<vmem>>, vector<1x16xf32>
    %231 = vector.broadcast %230 : vector<1x16xf32> to vector<8x16xf32>
    %232 = arith.addf %229, %231 : vector<8x16xf32>
    %cst_75 = arith.constant 0.000000e+00 : f32
    %233 = vector.broadcast %cst_75 : f32 to vector<8x16xf32>
    %234 = arith.maximumf %232, %233 : vector<8x16xf32>
    %c160 = arith.constant 160 : index
    %c0_76 = arith.constant 0 : index
    %235 = vector.load %arg1[%c160, %c0_76] : memref<176x128xbf16, #tpu.memory_space<vmem>>, vector<16x17xbf16>
    %236 = arith.truncf %234 : vector<8x16xf32> to vector<8x16xbf16>
    %cst_77 = arith.constant dense<0.000000e+00> : vector<8x17xf32>
    %237 = tpu.matmul %236, %235, %cst_77 {dimension_numbers = #tpu.dot_dimension_numbers<[1], [0], [0], [1], [0, 0, 1, 1], [], []>} : vector<8x16xbf16>, vector<16x17xbf16>, vector<8x17xf32> -> vector<8x17xf32>
    %c18 = arith.constant 18 : index
    %c0_78 = arith.constant 0 : index
    %238 = vector.load %arg2[%c18, %c0_78] : memref<24x128xf32, #tpu.memory_space<vmem>>, vector<1x17xf32>
    %239 = vector.broadcast %238 : vector<1x17xf32> to vector<8x17xf32>
    %240 = arith.addf %237, %239 : vector<8x17xf32>
    %241 = vector.extract_strided_slice %240 {offsets = [0, 0], sizes = [8, 16], strides = [1, 1]} : vector<8x17xf32> to vector<8x16xf32>
    %242 = vector.extract_strided_slice %240 {offsets = [0, 16], sizes = [8, 1], strides = [1, 1]} : vector<8x17xf32> to vector<8x1xf32>
    %cst_79 = arith.constant dense<0xFF800000> : vector<8xf32>
    %243 = vector.multi_reduction <maximumf>, %241, %cst_79 [1] : vector<8x16xf32> to vector<8xf32>
    %244 = vector.shape_cast %243 : vector<8xf32> to vector<8x1xf32>
    %245 = vector.broadcast %244 : vector<8x1xf32> to vector<8x16xf32>
    %246 = arith.subf %241, %245 : vector<8x16xf32>
    %247 = math.exp %246 : vector<8x16xf32>
    %cst_80 = arith.constant dense<0.000000e+00> : vector<8xf32>
    %248 = vector.multi_reduction <add>, %247, %cst_80 [1] : vector<8x16xf32> to vector<8xf32>
    %249 = vector.shape_cast %248 : vector<8xf32> to vector<8x1xf32>
    %250 = math.log %249 : vector<8x1xf32>
    %251 = arith.addf %250, %244 : vector<8x1xf32>
    %252 = vector.broadcast %251 : vector<8x1xf32> to vector<8x16xf32>
    %253 = arith.subf %241, %252 : vector<8x16xf32>
    %254 = math.tanh %242 : vector<8x1xf32>
    %cst_81 = arith.constant 0.000000e+00 : f32
    %255 = vector.broadcast %cst_81 : f32 to vector<8x111xf32>
    %256 = tpu.concatenate %253, %254, %255 in 1 : vector<8x16xf32>, vector<8x1xf32>, vector<8x111xf32> -> vector<8x128xf32>
    %c0_82 = arith.constant 0 : index
    %c0_83 = arith.constant 0 : index
    %257 = vector.load %arg3[%c0_82, %c0_83] : memref<8x128xf32, #tpu.memory_space<vmem>>, vector<8x128xf32>
    tpu.vector_store %arg3[%c0_82, %c0_83], %256 {strides = array<i32>} : memref<8x128xf32, #tpu.memory_space<vmem>>, vector<8x128xf32>,
    return
  }
}

</mosaic_0001>

<bundles_post_ra>
// kernel: my_encoder_net_forward.1
= control target key start
LH: loop header
LB: loop body
LE: loop exit
PB: predicated region body
PF: predicated region fallthrough
CT: control target
= control target key end

     0   :  { %8 = vsyncpa [#allocation3], 0  ;;  %s1691_s0 = inlined_call_operand.hbm [shape: f32[8,16], index: 0, kind: input, shape index: {}]   ;;  %s1692_s1 = inlined_call_operand.hbm [shape: bf16[176,128], index: 1, kind: input, shape index: {}]   ;;  %s1693_s2 = inlined_call_operand.hbm [shape: f32[24,128], index: 2, kind: input, shape index: {}]   ;;  %s1694_s3 = inlined_call_operand.vmem [shape: f32[8,128], index: 3, kind: output, shape index: {}]  }
   0x1   :  { %9 = vsyncpa [#allocation5], 0  ;;  %s1496_s12 = smov [#allocation4]   ;;  %s1426_s16 = scalar_lea.hbm %s1692_s1, 1408 }
   0x2   :  { %s25_s13 = sshll.u32 %s1496_s12, 4  ;;  %p1427_p0 = scmp.ne.s32.totalorder %s1692_s1, %s1426_s16  ;;  %s26_s13 = int_to_ptr.vmem [resolvable:$true] %s25_s13 }
   0x3   :  { %p1430_p1 = scmp.lt.u32.totalorder %s1426_s16, %s1692_s1 }
   0x5   :  { %p1432_p2 = pnand %p1430_p1, %p1427_p0 }
   0x7   :  { %1435 = shalt.err (!%p1432_p2)
}
   0x8   :  { %s1436_s21 = scalar_lea.vmem %s26_s13, 1408  ;;  %p1441_p4 = scmp.lt.s32.totalorder %s26_s13, %s26_s13 }
   0x9   :  { %p1437_p3 = scmp.ne.s32.totalorder %s26_s13, %s1436_s21  ;;  %p1442_p5 = scmp.lt.s32.totalorder %s1436_s21, %s1436_s21 }
   0xb   :  { %p1443_p6 = por %p1442_p5, %p1441_p4 }
   0xd   :  { %p1444_p7 = pnand %p1443_p6, %p1437_p3 }
   0xf   :  { %1447 = shalt.err (!%p1444_p7)
}
  0x10   :  { %s1497_s22 = smov 64   ;;  %s1498_s23 = smov 4  }
  0x11   :  { %31 = dma.hbm_to_vmem [thread:$0]  %s1692_s1, 1408, %s26_s13, [#allocation5], %s1497_s22, %s1497_s22, %s1498_s23  }
  0x12   :  { %s1499_s26 = smov [#allocation2]   ;;  %s1500_s28 = smov [#allocation6]  }
  0x13   :  { %s16_s27 = sshll.u32 %s1499_s26, 4  ;;  %s37_s29 = sshll.u32 %s1500_s28, 4  ;;  %s17_s27 = int_to_ptr.vmem [resolvable:$true] %s16_s27  ;;  %s38_s29 = int_to_ptr.vmem [resolvable:$true] %s37_s29 }
  0x14   :  { %s1448_s5 = scalar_lea.hbm %s1691_s0, 128 }
  0x15   :  { %p1449_p8 = scmp.ne.s32.totalorder %s1691_s0, %s1448_s5  ;;  %p1452_p9 = scmp.lt.u32.totalorder %s1448_s5, %s1691_s0 }
  0x17   :  { %p1454_p10 = pnand %p1452_p9, %p1449_p8 }
  0x19   :  { %1457 = shalt.err (!%p1454_p10)
}
  0x1a   :  { %s1458_s1 = scalar_lea.vmem %s17_s27, 128  ;;  %p1463_p12 = scmp.lt.s32.totalorder %s17_s27, %s17_s27 }
  0x1b   :  { %p1459_p11 = scmp.ne.s32.totalorder %s17_s27, %s1458_s1  ;;  %p1464_p13 = scmp.lt.s32.totalorder %s1458_s1, %s1458_s1 }
  0x1d   :  { %p1465_p0 = por %p1464_p13, %p1463_p12 }
  0x1f   :  { %p1466_p1 = pnand %p1465_p0, %p1459_p11 }
  0x21   :  { %1469 = shalt.err (!%p1466_p1)
}
  0x22   :  { %19 = dma.hbm_to_vmem [thread:$0]  %s1691_s0, 128, %s17_s27, [#allocation3]  }
  0x23   :  { %s1470_s14 = scalar_lea.hbm %s1693_s2, 384 }
  0x24   :  { %p1471_p2 = scmp.ne.s32.totalorder %s1693_s2, %s1470_s14  ;;  %p1474_p3 = scmp.lt.u32.totalorder %s1470_s14, %s1693_s2 }
  0x26   :  { %p1476_p4 = pnand %p1474_p3, %p1471_p2 }
  0x28   :  { %1479 = shalt.err (!%p1476_p4)
}
  0x29   :  { %s1480_s19 = scalar_lea.vmem %s38_s29, 384  ;;  %p1485_p6 = scmp.lt.s32.totalorder %s38_s29, %s38_s29 }
  0x2a   :  { %p1481_p5 = scmp.ne.s32.totalorder %s38_s29, %s1480_s19  ;;  %p1486_p7 = scmp.lt.s32.totalorder %s1480_s19, %s1480_s19 }
  0x2c   :  { %p1487_p8 = por %p1486_p7, %p1485_p6 }
  0x2e   :  { %p1488_p9 = pnand %p1487_p8, %p1481_p5 }
  0x30   :  { %1491 = shalt.err (!%p1488_p9)
}
  0x31   :  { %s1501_s0 = smov 128   ;;  %s1502_s20 = smov 8  }
  0x32   :  { %43 = dma.hbm_to_vmem [thread:$0]  %s1693_s2, 384, %s38_s29, [#allocation5], %s1501_s0, %s1501_s0, %s1502_s20  }
  0x33   :  { %1492 = dma.done.wait [#allocation3], 128  }
  0x34   :  { %1493 = vsyncadd [#allocation3], 4294967168 }
  0x35   :  { %1494 = dma.done.wait [#allocation5], 1792  }
  0x36   :  { %1495 = vsyncadd [#allocation5], 4294965504  ;;  %v1503_v0 = vmov 0.0   ;;  %vm1504_vm0 = vmmov 0   ;;  %v1385_v1 = vld [vmem:[#allocation4] sm:$0xff]   ;;  %v1573_v2 = vld [vmem:[#allocation2] sm:$0xff] }
  0x37   :  { %1265 = vmatprep.subr.bf16.mxu0 %v1503_v0  ;;  %1267 = vmatprep.mubr.msk.bf16.mxu0 %vm1504_vm0, %v1503_v0  ;;  %vm69_vm1 = vcmask 130048   ;;  %v57_v3 = vpack.c.bf16 %v1573_v2, %v1573_v2  ;;  %v1182_v4 = vld [vmem:[#allocation6] ss:$0 sm:$0xff]  ;;  %s1505_s2 = smov 120   ;;  %s1506_s23 = smov 112   ;;  %vm117_vm2 = vcmask 64512  }
  0x38   :  { %1271 = vmatprep.subr.bf16.mxu1 %v1503_v0  ;;  %1273 = vmatprep.mubr.msk.bf16.mxu1 %vm1504_vm0, %v1503_v0  ;;  %s1507_s24 = smov 104   ;;  %s1508_s25 = smov 96   ;;  %vm181_vm3 = vcmask 1043456   ;;  %v1386_v48 = vld [vmem:[#allocation4 + $0x8] sm:$0xff]   ;;  %v1189_v60 = vld [vmem:[#allocation6 + $0x1] ss:$0 sm:$0xff] }
  0x39   :  { %1266 = vmatpush3.bf16.msra.mxu0 %v1385_v1  ;;  %s1509_s26 = smov 88   ;;  %vm504_vm4 = vcmask 261120   ;;  %vm1173_vm5 = vcmask 138240  }
  0x3a   :  { %1277 = vmatprep.subr.bf16.mxu0 %v1503_v0 }
  0x3c   :  { %1268 = vmatmul.mubr.msk.bf16.vlgmr.msra.gmra.mrb[0].mxu0 %vm69_vm1, %v57_v3 }
  0x3d   :  { %1279 = vmatprep.mubr.msk.bf16.mxu0 %vm1504_vm0, %v1503_v0 }
 0x10f   :  { %v107_v5 = vpop.f32.mrb[0].mxu0 }
 0x110   :  { %v108_v6 = vadd.f32 %v1182_v4, %v107_v5  ;;  %v1269_v7 = vpop.f32.mrb[1].mxu0 }
 0x111   :  { %v110_v8 = vpop.f32.mrb[2].mxu0 }
 0x112   :  { %v113_v9 = vpack.c.bf16 %v108_v6, %v108_v6  ;;  %v1270_v10 = vpop.f32.mrb[3].mxu0 }
 0x114   :  { %225 = vrot.lane.b32.xlu1 %v113_v9, %s1505_s2  ;;  %115 = vrot.lane.b32.xlu0 %v113_v9, %s1506_s23 }
 0x118   :  { %227 = vrot.lane.b32.xlu0 %v113_v9, %s1507_s24 }
 0x186   :  { %v116_v11 = vpop.permute.xlu0 %115  ;;  %v226_v15 = vpop.permute.xlu1 %225 }
 0x187   :  { %v122_v12 = vsel %vm117_vm2, %v116_v11, 0  ;;  %v1387_v11 = vld [vmem:[#allocation4 + $0x10] sm:$0xff]  }
 0x188   :  { %1272 = vmatpush3.bf16.xpose.msra.mxu1 %v122_v12 }
 0x189   :  { %1283 = vmatprep.subr.bf16.mxu1 %v1503_v0 }
 0x18a   :  { %v228_v13 = vpop.permute.xlu0 %227 }
 0x18b   :  { %v233_v14 = vsel %vm117_vm2, %v228_v13, 0 }
 0x18f   :  { %1274 = vmatmul.mubr.msk.bf16.vlgmr.msra.gmra.mrb[0].mxu1 %vm117_vm2, %v113_v9 }
 0x190   :  { %1284 = vmatpush3.bf16.xpose.msra.mxu1 %v233_v14  ;;  %1285 = vmatprep.mubr.msk.bf16.mxu1 %vm1504_vm0, %v1503_v0 }
 0x191   :  { %1295 = vmatprep.subr.bf16.mxu1 %v1503_v0 }
 0x197   :  { %1286 = vmatmul.mubr.msk.bf16.vlgmr.msra.gmra.mrb[4].mxu1 %vm117_vm2, %v226_v15 }
 0x198   :  { %1297 = vmatprep.mubr.msk.bf16.mxu1 %vm1504_vm0, %v1503_v0  ;;  %1296 = vmatpush3.bf16.msra.mxu1 %v1386_v48 }
 0x199   :  { %1307 = vmatprep.subr.bf16.mxu1 %v1503_v0 }
 0x262   :  { %v158_v16 = vpop.f32.mrb[0].mxu1 }
 0x263   :  { %v1275_v17 = vpop.f32.mrb[1].mxu1  ;;  %v164_v18 = vsel %vm117_vm2, %v158_v16, -inf }
 0x264   :  { %165 = vmax.xlane.f32.xlu1 %v164_v18  ;;  %v161_v19 = vpop.f32.mrb[2].mxu1  ;;  %v1193_v17 = vld [vmem:[#allocation6 + $0x5] ss:$0 sm:$0xff] }
 0x265   :  { %v1276_v20 = vpop.f32.mrb[3].mxu1 }
 0x26a   :  { %v269_v21 = vpop.f32.mrb[4].mxu1 }
 0x26b   :  { %v1287_v22 = vpop.f32.mrb[5].mxu1  ;;  %v275_v23 = vsel %vm117_vm2, %v269_v21, -inf }
 0x26c   :  { %276 = vmax.xlane.f32.xlu0 %v275_v23  ;;  %v272_v24 = vpop.f32.mrb[6].mxu1  ;;  %v1389_v22 = vld [vmem:[#allocation4 + $0x20] sm:$0xff]   ;;  %v1194_v23 = vld [vmem:[#allocation6 + $0x2] ss:$0 sm:$0xff] }
 0x26d   :  { %v1288_v25 = vpop.f32.mrb[7].mxu1 }
 0x2f1   :  { %v166_v26 = vpop.xlane.xlu1 %165 }
 0x2f2   :  { %v167_v27 = vsub.f32 %v158_v16, %v166_v26 }
 0x2f4   :  { %v168_v28 = vmul.f32 1.442695, %v167_v27 }
 0x2f6   :  { %1396 = vpow2.f32 %v168_v28 }
 0x2f9   :  { %v277_v29 = vpop.xlane.xlu0 %276 }
 0x2fa   :  { %v278_v30 = vsub.f32 %v269_v21, %v277_v29  ;;  %v1388_v21 = vld [vmem:[#allocation4 + $0x18] sm:$0xff]  }
 0x2fc   :  { %v279_v31 = vmul.f32 1.442695, %v278_v30 }
 0x2fe   :  { %1398 = vpow2.f32 %v279_v31  ;;  %v1197_v31 = vld [vmem:[#allocation6 + $0x3] ss:$0 sm:$0xff] }
 0x300   :  { %v1397_v32 = vpop.eup %1396 }
 0x301   :  { %v170_v33 = vsel %vm117_vm2, %v1397_v32, 0.0 }
 0x302   :  { %171 = vadd.xlane.f32.xlu0 %v170_v33 }
 0x308   :  { %v1399_v34 = vpop.eup %1398 }
 0x309   :  { %v281_v35 = vsel %vm117_vm2, %v1399_v34, 0.0 }
 0x30a   :  { %282 = vadd.xlane.f32.xlu1 %v281_v35 }
 0x318   :  { %176 = vrot.lane.b32.xlu0 %v113_v9, %s1508_s25 }
 0x31b   :  { %287 = vrot.lane.b32.xlu1 %v113_v9, %s1509_s26 }
 0x38f   :  { %v172_v36 = vpop.xlane.xlu0 %171 }
 0x390   :  { %1400 = vrcp.f32 %v172_v36 }
 0x393   :  { %v177_v37 = vpop.permute.xlu0 %176 }
 0x394   :  { %v183_v38 = vsel %vm181_vm3, %v177_v37, 0 }
 0x395   :  { %1278 = vmatpush3.bf16.msra.mxu0 %v183_v38 }
 0x396   :  { %1289 = vmatprep.subr.bf16.mxu0 %v1503_v0 }
 0x397   :  { %v283_v39 = vpop.xlane.xlu1 %282 }
 0x398   :  { %1402 = vrcp.f32 %v283_v39 }
 0x39a   :  { %v1401_v40 = vpop.eup %1400 }
 0x39b   :  { %v174_v41 = vmul.f32 %v1401_v40, %v1397_v32  ;;  %v288_v42 = vpop.permute.xlu1 %287 }
 0x39c   :  { %v293_v44 = vsel %vm181_vm3, %v288_v42, 0 }
 0x39d   :  { %v175_v43 = vpack.c.bf16 %v174_v41, %v174_v41 }
 0x39f   :  { %1280 = vmatmul.mubr.msk.bf16.vlgmr.msra.gmra.mrb[4].mxu0 %vm117_vm2, %v175_v43 }
 0x3a0   :  { %1290 = vmatpush3.bf16.msra.mxu0 %v293_v44  ;;  %1291 = vmatprep.mubr.msk.bf16.mxu0 %vm1504_vm0, %v1503_v0  ;;  %v1390_v44 = vld [vmem:[#allocation4 + $0x28] sm:$0xff]  }
 0x3a1   :  { %1301 = vmatprep.subr.bf16.mxu0 %v1503_v0 }
 0x3a2   :  { %v1403_v45 = vpop.eup %1402 }
 0x3a3   :  { %v285_v46 = vmul.f32 %v1403_v45, %v1399_v34 }
 0x3a5   :  { %v286_v47 = vpack.c.bf16 %v285_v46, %v285_v46 }
 0x3a7   :  { %1292 = vmatmul.mubr.msk.bf16.vlgmr.msra.gmra.mrb[8].mxu0 %vm117_vm2, %v286_v47 }
 0x3a8   :  { %1303 = vmatprep.mubr.msk.bf16.mxu0 %vm1504_vm0, %v1503_v0  ;;  %1302 = vmatpush3.bf16.msra.mxu0 %v1387_v11 }
 0x3a9   :  { %1315 = vmatprep.subr.bf16.mxu0 %v1503_v0 }
 0x472   :  { %v219_v49 = vpop.f32.mrb[4].mxu0 }
 0x473   :  { %v1281_v50 = vpop.f32.mrb[5].mxu0 }
 0x474   :  { %v222_v51 = vpop.f32.mrb[6].mxu0 }
 0x475   :  { %v1282_v52 = vpop.f32.mrb[7].mxu0  ;;  %v1202_v51 = vld [vmem:[#allocation6 + $0x7] ss:$0 sm:$0xff] }
 0x47a   :  { %v329_v53 = vpop.f32.mrb[8].mxu0 }
 0x47b   :  { %336 = vrot.lane.b32.xlu1 %v329_v53, %s1502_s20  ;;  %v1293_v54 = vpop.f32.mrb[9].mxu0 }
 0x47c   :  { %v332_v55 = vpop.f32.mrb[10].mxu0 }
 0x47d   :  { %v1294_v56 = vpop.f32.mrb[11].mxu0  ;;  %v1203_v55 = vld [vmem:[#allocation6 + $0x8] ss:$0 sm:$0xff] }
 0x4ed   :  { %v337_v57 = vpop.permute.xlu1 %336 }
 0x4ee   :  { %v339_v58 = vsel %vm117_vm2, %v219_v49, %v337_v57  ;;  %v1201_v49 = vld [vmem:[#allocation6 + $0x6] ss:$0 sm:$0xff] }
 0x4ef   :  { %v342_v59 = vpack.c.bf16 %v339_v58, %v339_v58 }
 0x4f1   :  { %1298 = vmatmul.mubr.msk.bf16.vlgmr.msra.gmra.mrb[8].mxu1 %vm69_vm1, %v342_v59 }
 0x4f2   :  { %1311 = vmatprep.mubr.msk.bf16.mxu1 %vm1504_vm0, %v1503_v0  ;;  %1308 = vmatpush3.bf16.msra.mxu1 %v1388_v21 }
 0x4f3   :  { %1309 = vmatprep.subr.bf16.mxu1 %v1503_v0 }
 0x4f6   :  { %1310 = vmatpush3.bf16.msra.mxu1 %v1389_v22 }
 0x4f7   :  { %1321 = vmatprep.subr.bf16.mxu1 %v1503_v0 }
 0x5c4   :  { %v391_v61 = vpop.f32.mrb[8].mxu1 }
 0x5c5   :  { %v392_v62 = vadd.f32 %v1189_v60, %v391_v61  ;;  %v1299_v63 = vpop.f32.mrb[9].mxu1 }
 0x5c6   :  { %v394_v1 = vpop.f32.mrb[10].mxu1 }
 0x5c7   :  { %v1300_v3 = vpop.f32.mrb[11].mxu1  ;;  %v397_v4 = vadd.f32 %v392_v62, %v1573_v2  ;;  %v1192_v2 = vld [vmem:[#allocation6 + $0x4] ss:$0 sm:$0xff] }
 0x5c9   :  { %v398_v5 = vsel %vm69_vm1, %v397_v4, 0.0 }
 0x5ca   :  { %399 = vadd.xlane.f32.xlu0 %v398_v5 }
 0x657   :  { %v400_v6 = vpop.xlane.xlu0 %399 }
 0x658   :  { %v402_v7 = vmul.f32 0.0625, %v400_v6 }
 0x65a   :  { %v403_v8 = vsub.f32 %v397_v4, %v402_v7 }
 0x65c   :  { %v404_v9 = vmul.f32 %v403_v8, %v403_v8 }
 0x65e   :  { %v405_v10 = vsel %vm69_vm1, %v404_v9, 0.0 }
 0x65f   :  { %406 = vadd.xlane.f32.xlu1 %v405_v10 }
 0x6ec   :  { %v407_v12 = vpop.xlane.xlu1 %406 }
 0x6ed   :  { %v408_v13 = vmul.f32 0.0625, %v407_v12 }
 0x6ef   :  { %v409_v14 = vadd.f32 1e-05, %v408_v13 }
 0x6f1   :  { %1404 = vrsqrt.f32 %v409_v14 }
 0x6fb   :  { %v1405_v15 = vpop.eup %1404 }
 0x6fc   :  { %v411_v16 = vmul.f32 %v1405_v15, %v403_v8 }
 0x6fe   :  { %v417_v18 = vmul.f32 %v1192_v2, %v411_v16 }
 0x700   :  { %v423_v19 = vadd.f32 %v1193_v17, %v417_v18 }
 0x702   :  { %v426_v20 = vpack.c.bf16 %v423_v19, %v423_v19 }
 0x704   :  { %1304 = vmatmul.mubr.msk.bf16.vlgmr.msra.gmra.mrb[12].mxu0 %vm69_vm1, %v426_v20 }
 0x705   :  { %1317 = vmatprep.mubr.msk.bf16.mxu0 %vm1504_vm0, %v1503_v0  ;;  %1316 = vmatpush3.bf16.msra.mxu0 %v1390_v44 }
 0x706   :  { %1327 = vmatprep.subr.bf16.mxu0 %v1503_v0 }
 0x7d7   :  { %v475_v24 = vpop.f32.mrb[12].mxu0 }
 0x7d8   :  { %v476_v25 = vadd.f32 %v1194_v23, %v475_v24  ;;  %v1305_v26 = vpop.f32.mrb[13].mxu0 }
 0x7d9   :  { %v478_v27 = vpop.f32.mrb[14].mxu0 }
 0x7da   :  { %v481_v28 = vmax.f32 %v476_v25, 0.0  ;;  %v1306_v29 = vpop.f32.mrb[15].mxu0 }
 0x7dc   :  { %v486_v30 = vpack.c.bf16 %v481_v28, %v481_v28 }
 0x7de   :  { %1312 = vmatmul.mubr.msk.bf16.vlgmr.msra.gmra.mrb[12].mxu1 %vm504_vm4, %v486_v30 }
 0x7df   :  { %1323 = vmatprep.mubr.msk.bf16.mxu1 %vm1504_vm0, %v1503_v0 }
 0x8b1   :  { %v542_v32 = vpop.f32.mrb[12].mxu1 }
 0x8b2   :  { %v543_v33 = vadd.f32 %v1197_v31, %v542_v32  ;;  %v1313_v34 = vpop.f32.mrb[13].mxu1 }
 0x8b3   :  { %v545_v35 = vpop.f32.mrb[14].mxu1 }
 0x8b4   :  { %v1314_v36 = vpop.f32.mrb[15].mxu1  ;;  %v548_v37 = vadd.f32 %v543_v33, %v423_v19 }
 0x8b5   :  { %v1391_v36 = vld [vmem:[#allocation4 + $0x30] sm:$0xff]  }
 0x8b6   :  { %v549_v38 = vsel %vm69_vm1, %v548_v37, 0.0 }
 0x8b7   :  { %550 = vadd.xlane.f32.xlu0 %v549_v38 }
 0x944   :  { %v551_v39 = vpop.xlane.xlu0 %550 }
 0x945   :  { %v552_v40 = vmul.f32 0.0625, %v551_v39 }
 0x947   :  { %v553_v41 = vsub.f32 %v548_v37, %v552_v40 }
 0x949   :  { %v554_v42 = vmul.f32 %v553_v41, %v553_v41 }
 0x94b   :  { %v555_v43 = vsel %vm69_vm1, %v554_v42, 0.0 }
 0x94c   :  { %556 = vadd.xlane.f32.xlu0 %v555_v43 }
 0x9d9   :  { %v557_v45 = vpop.xlane.xlu0 %556 }
 0x9da   :  { %v558_v46 = vmul.f32 0.0625, %v557_v45 }
 0x9dc   :  { %v559_v47 = vadd.f32 1e-05, %v558_v46 }
 0x9de   :  { %1406 = vrsqrt.f32 %v559_v47 }
 0x9e8   :  { %v1407_v48 = vpop.eup %1406 }
 0x9e9   :  { %v561_v50 = vmul.f32 %v1407_v48, %v553_v41  ;;  %v1210_v48 = vld [vmem:[#allocation6 + $0x9] ss:$0 sm:$0xff] }
 0x9eb   :  { %v567_v52 = vmul.f32 %v1201_v49, %v561_v50 }
 0x9ed   :  { %v1631_v53 = vadd.f32 %v1202_v51, %v567_v52 }
 0x9ef   :  { %v576_v54 = vpack.c.bf16 %v1631_v53, %v1631_v53 }
 0x9f1   :  { %1318 = vmatmul.mubr.msk.bf16.vlgmr.msra.gmra.mrb[16].mxu0 %vm69_vm1, %v576_v54 }
 0x9f2   :  { %1329 = vmatprep.mubr.msk.bf16.mxu0 %vm1504_vm0, %v1503_v0 }
 0xac4   :  { %v625_v56 = vpop.f32.mrb[16].mxu0 }
 0xac5   :  { %v626_v57 = vadd.f32 %v1203_v55, %v625_v56  ;;  %v1319_v58 = vpop.f32.mrb[17].mxu0 }
 0xac6   :  { %v628_v59 = vpop.f32.mrb[18].mxu0 }
 0xac7   :  { %v631_v60 = vpack.c.bf16 %v626_v57, %v626_v57  ;;  %v1320_v61 = vpop.f32.mrb[19].mxu0 }
 0xac9   :  { %743 = vrot.lane.b32.xlu0 %v631_v60, %s1507_s24  ;;  %633 = vrot.lane.b32.xlu1 %v631_v60, %s1506_s23 }
 0xacd   :  { %741 = vrot.lane.b32.xlu1 %v631_v60, %s1505_s2 }
 0xb3b   :  { %v634_v62 = vpop.permute.xlu1 %633  ;;  %v744_v1 = vpop.permute.xlu0 %743 }
 0xb3c   :  { %v639_v63 = vsel %vm117_vm2, %v634_v62, 0  ;;  %v749_v3 = vsel %vm117_vm2, %v744_v1, 0  ;;  %v1392_v62 = vld [vmem:[#allocation4 + $0x38] sm:$0xff]  }
 0xb3d   :  { %1322 = vmatpush3.bf16.xpose.msra.mxu1 %v639_v63 }
 0xb3e   :  { %1333 = vmatprep.subr.bf16.mxu1 %v1503_v0 }
 0xb3f   :  { %v742_v4 = vpop.permute.xlu1 %741 }
 0xb44   :  { %1324 = vmatmul.mubr.msk.bf16.vlgmr.msra.gmra.mrb[16].mxu1 %vm117_vm2, %v631_v60 }
 0xb45   :  { %1334 = vmatpush3.bf16.xpose.msra.mxu1 %v749_v3  ;;  %1335 = vmatprep.mubr.msk.bf16.mxu1 %vm1504_vm0, %v1503_v0 }
 0xb46   :  { %1345 = vmatprep.subr.bf16.mxu1 %v1503_v0 }
 0xb4c   :  { %1336 = vmatmul.mubr.msk.bf16.vlgmr.msra.gmra.mrb[20].mxu1 %vm117_vm2, %v742_v4 }
 0xb4d   :  { %1347 = vmatprep.mubr.msk.bf16.mxu1 %vm1504_vm0, %v1503_v0  ;;  %1346 = vmatpush3.bf16.msra.mxu1 %v1391_v36  ;;  %v1222_v36 = vld [vmem:[#allocation6 + $0xe] ss:$0 sm:$0xff] }
 0xb4e   :  { %1357 = vmatprep.subr.bf16.mxu1 %v1503_v0 }
 0xc17   :  { %v675_v5 = vpop.f32.mrb[16].mxu1 }
 0xc18   :  { %v1325_v6 = vpop.f32.mrb[17].mxu1  ;;  %v681_v7 = vsel %vm117_vm2, %v675_v5, -inf }
 0xc19   :  { %682 = vmax.xlane.f32.xlu1 %v681_v7  ;;  %v678_v8 = vpop.f32.mrb[18].mxu1  ;;  %v1214_v6 = vld [vmem:[#allocation6 + $0xd] ss:$0 sm:$0xff] }
 0xc1a   :  { %v1326_v9 = vpop.f32.mrb[19].mxu1 }
 0xc1f   :  { %v785_v10 = vpop.f32.mrb[20].mxu1 }
 0xc20   :  { %v1337_v11 = vpop.f32.mrb[21].mxu1  ;;  %v791_v12 = vsel %vm117_vm2, %v785_v10, -inf }
 0xc21   :  { %792 = vmax.xlane.f32.xlu0 %v791_v12  ;;  %v788_v13 = vpop.f32.mrb[22].mxu1  ;;  %v1394_v11 = vld [vmem:[#allocation4 + $0x48] sm:$0xff]   ;;  %v1215_v12 = vld [vmem:[#allocation6 + $0xa] ss:$0 sm:$0xff] }
 0xc22   :  { %v1338_v14 = vpop.f32.mrb[23].mxu1 }
 0xca6   :  { %v683_v15 = vpop.xlane.xlu1 %682 }
 0xca7   :  { %v684_v2 = vsub.f32 %v675_v5, %v683_v15 }
 0xca9   :  { %v685_v16 = vmul.f32 1.442695, %v684_v2 }
 0xcab   :  { %1408 = vpow2.f32 %v685_v16 }
 0xcae   :  { %v793_v17 = vpop.xlane.xlu0 %792 }
 0xcaf   :  { %v794_v18 = vsub.f32 %v785_v10, %v793_v17  ;;  %v1393_v10 = vld [vmem:[#allocation4 + $0x40] sm:$0xff]  }
 0xcb1   :  { %v795_v19 = vmul.f32 1.442695, %v794_v18 }
 0xcb3   :  { %1410 = vpow2.f32 %v795_v19  ;;  %v1218_v19 = vld [vmem:[#allocation6 + $0xb] ss:$0 sm:$0xff] }
 0xcb5   :  { %v1409_v20 = vpop.eup %1408 }
 0xcb6   :  { %v687_v21 = vsel %vm117_vm2, %v1409_v20, 0.0 }
 0xcb7   :  { %688 = vadd.xlane.f32.xlu0 %v687_v21 }
 0xcbd   :  { %v1411_v22 = vpop.eup %1410 }
 0xcbe   :  { %v797_v23 = vsel %vm117_vm2, %v1411_v22, 0.0 }
 0xcbf   :  { %798 = vadd.xlane.f32.xlu1 %v797_v23 }
 0xccd   :  { %693 = vrot.lane.b32.xlu0 %v631_v60, %s1508_s25 }
 0xcd0   :  { %803 = vrot.lane.b32.xlu1 %v631_v60, %s1509_s26 }
 0xd44   :  { %v689_v24 = vpop.xlane.xlu0 %688 }
 0xd45   :  { %1412 = vrcp.f32 %v689_v24 }
 0xd48   :  { %v694_v25 = vpop.permute.xlu0 %693 }
 0xd49   :  { %v699_v26 = vsel %vm181_vm3, %v694_v25, 0 }
 0xd4a   :  { %1328 = vmatpush3.bf16.msra.mxu0 %v699_v26 }
 0xd4b   :  { %1339 = vmatprep.subr.bf16.mxu0 %v1503_v0 }
 0xd4c   :  { %v799_v27 = vpop.xlane.xlu1 %798 }
 0xd4d   :  { %1414 = vrcp.f32 %v799_v27 }
 0xd4f   :  { %v1413_v28 = vpop.eup %1412 }
 0xd50   :  { %v691_v29 = vmul.f32 %v1413_v28, %v1409_v20  ;;  %v804_v30 = vpop.permute.xlu1 %803 }
 0xd51   :  { %v809_v32 = vsel %vm181_vm3, %v804_v30, 0 }
 0xd52   :  { %v692_v31 = vpack.c.bf16 %v691_v29, %v691_v29 }
 0xd54   :  { %1330 = vmatmul.mubr.msk.bf16.vlgmr.msra.gmra.mrb[20].mxu0 %vm117_vm2, %v692_v31  ;;  %v1395_v31 = vld [vmem:[#allocation4 + $0x50] sm:$0xff]  }
 0xd55   :  { %1340 = vmatpush3.bf16.msra.mxu0 %v809_v32  ;;  %1341 = vmatprep.mubr.msk.bf16.mxu0 %vm1504_vm0, %v1503_v0 }
 0xd56   :  { %1351 = vmatprep.subr.bf16.mxu0 %v1503_v0 }
 0xd57   :  { %v1415_v33 = vpop.eup %1414 }
 0xd58   :  { %v801_v34 = vmul.f32 %v1415_v33, %v1411_v22 }
 0xd5a   :  { %v802_v35 = vpack.c.bf16 %v801_v34, %v801_v34 }
 0xd5c   :  { %1342 = vmatmul.mubr.msk.bf16.vlgmr.msra.gmra.mrb[24].mxu0 %vm117_vm2, %v802_v35 }
 0xd5d   :  { %1353 = vmatprep.mubr.msk.bf16.mxu0 %vm1504_vm0, %v1503_v0  ;;  %1352 = vmatpush3.bf16.msra.mxu0 %v1392_v62 }
 0xd5e   :  { %1365 = vmatprep.subr.bf16.mxu0 %v1503_v0 }
 0xe27   :  { %v735_v37 = vpop.f32.mrb[20].mxu0 }
 0xe28   :  { %v1331_v38 = vpop.f32.mrb[21].mxu0 }
 0xe29   :  { %v738_v39 = vpop.f32.mrb[22].mxu0  ;;  %v1223_v38 = vld [vmem:[#allocation6 + $0xf] ss:$0 sm:$0xff] }
 0xe2a   :  { %v1332_v40 = vpop.f32.mrb[23].mxu0 }
 0xe2b   :  { %v1224_v40 = vld [vmem:[#allocation6 + $0x10] ss:$0 sm:$0xff] }
 0xe2f   :  { %v845_v41 = vpop.f32.mrb[24].mxu0 }
 0xe30   :  { %852 = vrot.lane.b32.xlu1 %v845_v41, %s1502_s20  ;;  %v1343_v42 = vpop.f32.mrb[25].mxu0 }
 0xe31   :  { %v848_v43 = vpop.f32.mrb[26].mxu0  ;;  %v1225_v42 = vld [vmem:[#allocation6 + $0x11] ss:$0 sm:$0xff] }
 0xe32   :  { %v1344_v44 = vpop.f32.mrb[27].mxu0 }
 0xea2   :  { %v853_v45 = vpop.permute.xlu1 %852 }
 0xea3   :  { %v855_v46 = vsel %vm117_vm2, %v735_v37, %v853_v45 }
 0xea4   :  { %v858_v47 = vpack.c.bf16 %v855_v46, %v855_v46 }
 0xea6   :  { %1348 = vmatmul.mubr.msk.bf16.vlgmr.msra.gmra.mrb[24].mxu1 %vm69_vm1, %v858_v47  ;;  %v1226_v47 = vld [vmem:[#allocation6 + $0x12] ss:$0 sm:$0xff] }
 0xea7   :  { %1361 = vmatprep.mubr.msk.bf16.mxu1 %vm1504_vm0, %v1503_v0  ;;  %1358 = vmatpush3.bf16.msra.mxu1 %v1393_v10 }
 0xea8   :  { %1359 = vmatprep.subr.bf16.mxu1 %v1503_v0 }
 0xeab   :  { %1360 = vmatpush3.bf16.msra.mxu1 %v1394_v11 }
 0xf79   :  { %v907_v49 = vpop.f32.mrb[24].mxu1 }
 0xf7a   :  { %v908_v50 = vadd.f32 %v1210_v48, %v907_v49  ;;  %v1349_v51 = vpop.f32.mrb[25].mxu1 }
 0xf7b   :  { %v910_v52 = vpop.f32.mrb[26].mxu1 }
 0xf7c   :  { %v1350_v54 = vpop.f32.mrb[27].mxu1  ;;  %v913_v55 = vadd.f32 %v908_v50, %v1631_v53  ;;  %v1213_v53 = vld [vmem:[#allocation6 + $0xc] ss:$0 sm:$0xff] }
 0xf7e   :  { %v914_v56 = vsel %vm69_vm1, %v913_v55, 0.0 }
 0xf7f   :  { %915 = vadd.xlane.f32.xlu0 %v914_v56 }
0x100c   :  { %v916_v57 = vpop.xlane.xlu0 %915 }
0x100d   :  { %v917_v58 = vmul.f32 0.0625, %v916_v57 }
0x100f   :  { %v918_v59 = vsub.f32 %v913_v55, %v917_v58 }
0x1011   :  { %v919_v60 = vmul.f32 %v918_v59, %v918_v59 }
0x1013   :  { %v920_v61 = vsel %vm69_vm1, %v919_v60, 0.0 }
0x1014   :  { %921 = vadd.xlane.f32.xlu1 %v920_v61 }
0x10a1   :  { %v922_v63 = vpop.xlane.xlu1 %921 }
0x10a2   :  { %v923_v1 = vmul.f32 0.0625, %v922_v63 }
0x10a4   :  { %v924_v3 = vadd.f32 1e-05, %v923_v1 }
0x10a6   :  { %1416 = vrsqrt.f32 %v924_v3 }
0x10b0   :  { %v1417_v4 = vpop.eup %1416 }
0x10b1   :  { %v926_v5 = vmul.f32 %v1417_v4, %v918_v59 }
0x10b3   :  { %v932_v7 = vmul.f32 %v1213_v53, %v926_v5 }
0x10b5   :  { %v938_v8 = vadd.f32 %v1214_v6, %v932_v7 }
0x10b7   :  { %v941_v9 = vpack.c.bf16 %v938_v8, %v938_v8 }
0x10b9   :  { %1354 = vmatmul.mubr.msk.bf16.vlgmr.msra.gmra.mrb[28].mxu0 %vm69_vm1, %v941_v9 }
0x10ba   :  { %1367 = vmatprep.mubr.msk.bf16.mxu0 %vm1504_vm0, %v1503_v0  ;;  %1366 = vmatpush3.bf16.msra.mxu0 %v1395_v31 }
0x118c   :  { %v990_v13 = vpop.f32.mrb[28].mxu0 }
0x118d   :  { %v991_v14 = vadd.f32 %v1215_v12, %v990_v13  ;;  %v1355_v15 = vpop.f32.mrb[29].mxu0 }
0x118e   :  { %v993_v2 = vpop.f32.mrb[30].mxu0 }
0x118f   :  { %v996_v16 = vmax.f32 %v991_v14, 0.0  ;;  %v1356_v17 = vpop.f32.mrb[31].mxu0 }
0x1191   :  { %v1001_v18 = vpack.c.bf16 %v996_v16, %v996_v16 }
0x1193   :  { %1362 = vmatmul.mubr.msk.bf16.vlgmr.msra.gmra.mrb[28].mxu1 %vm504_vm4, %v1001_v18 }
0x1266   :  { %v1056_v20 = vpop.f32.mrb[28].mxu1 }
0x1267   :  { %v1057_v21 = vadd.f32 %v1218_v19, %v1056_v20  ;;  %v1363_v22 = vpop.f32.mrb[29].mxu1 }
0x1268   :  { %v1059_v23 = vpop.f32.mrb[30].mxu1 }
0x1269   :  { %v1364_v24 = vpop.f32.mrb[31].mxu1  ;;  %v1062_v25 = vadd.f32 %v1057_v21, %v938_v8 }
0x126b   :  { %v1063_v0 = vsel %vm69_vm1, %v1062_v25, 0.0 }
0x126c   :  { %1064 = vadd.xlane.f32.xlu0 %v1063_v0 }
0x12f9   :  { %v1065_v26 = vpop.xlane.xlu0 %1064 }
0x12fa   :  { %v1066_v27 = vmul.f32 0.0625, %v1065_v26 }
0x12fc   :  { %v1067_v28 = vsub.f32 %v1062_v25, %v1066_v27 }
0x12fe   :  { %v1068_v29 = vmul.f32 %v1067_v28, %v1067_v28 }
0x1300   :  { %v1069_v30 = vsel %vm69_vm1, %v1068_v29, 0.0 }
0x1301   :  { %1070 = vadd.xlane.f32.xlu0 %v1069_v30 }
0x138e   :  { %v1071_v32 = vpop.xlane.xlu0 %1070 }
0x138f   :  { %v1072_v33 = vmul.f32 0.0625, %v1071_v32 }
0x1391   :  { %v1073_v34 = vadd.f32 1e-05, %v1072_v33 }
0x1393   :  { %1418 = vrsqrt.f32 %v1073_v34 }
0x139d   :  { %v1419_v35 = vpop.eup %1418 }
0x139e   :  { %v1075_v37 = vmul.f32 %v1419_v35, %v1067_v28 }
0x13a0   :  { %v1081_v39 = vmul.f32 %v1222_v36, %v1075_v37 }
0x13a2   :  { %v1087_v41 = vadd.f32 %v1223_v38, %v1081_v39 }
0x13a4   :  { %v1093_v43 = vmul.f32 %v1224_v40, %v1087_v41 }
0x13a6   :  { %v1099_v44 = vadd.f32 %v1225_v42, %v1093_v43 }
0x13a8   :  { %v1100_v45 = vmax.f32 %v1099_v44, 0.0 }
0x13aa   :  { %v1103_v46 = vpack.c.bf16 %v1100_v45, %v1100_v45 }
0x13ac   :  { %1368 = vmatmul.mubr.msk.bf16.vlgmr.msra.gmra.mrb[32].mxu0 %vm69_vm1, %v1103_v46 }
0x147f   :  { %v1152_v48 = vpop.f32.mrb[32].mxu0 }
0x1480   :  { %v1153_v49 = vadd.f32 %v1226_v47, %v1152_v48  ;;  %v1369_v50 = vpop.f32.mrb[33].mxu0 }
0x1481   :  { %v1155_v51 = vpop.f32.mrb[34].mxu0 }
0x1482   :  { %v1370_v52 = vpop.f32.mrb[35].mxu0  ;;  %v1158_v54 = vsel %vm69_vm1, %v1153_v49, -inf }
0x1483   :  { %1159 = vmax.xlane.f32.xlu1 %v1158_v54 }
0x1510   :  { %v1160_v55 = vpop.xlane.xlu1 %1159 }
0x1511   :  { %v1161_v56 = vsub.f32 %v1153_v49, %v1160_v55 }
0x1513   :  { %v1162_v57 = vmul.f32 1.442695, %v1161_v56 }
0x1515   :  { %1420 = vpow2.f32 %v1162_v57 }
0x151f   :  { %v1421_v58 = vpop.eup %1420 }
0x1520   :  { %v1164_v59 = vsel %vm69_vm1, %v1421_v58, 0.0 }
0x1521   :  { %1165 = vadd.xlane.f32.xlu0 %v1164_v59 }
0x15ae   :  { %v1166_v60 = vpop.xlane.xlu0 %1165 }
0x15af   :  { %1422 = vlog2.f32 %v1166_v60 }
0x15b0   :  { %1424 = vtanh.f32 %v1153_v49 }
0x15b9   :  { %v1423_v61 = vpop.eup %1422 }
0x15ba   :  { %v1168_v62 = vmul.f32 0.6931472, %v1423_v61  ;;  %v1425_v3 = vpop.eup %1424 }
0x15bc   :  { %v1169_v63 = vadd.f32 %v1168_v62, %v1160_v55 }
0x15be   :  { %v1170_v1 = vsub.f32 %v1153_v49, %v1169_v63 }
0x15c0   :  { %v1172_v4 = vsel %vm69_vm1, %v1170_v1, %v1425_v3 }
0x15c1   :  { %v1174_v53 = vsel %vm1173_vm5, %v1172_v4, 0.0 }
0x15c2   :  { %1175 = vst [vmem:[%s1694_s3] sm:$0xff] %v1174_v53 }
0x15c3   :  { %1180 = vsyncpa [#allocation3], 1 }
0x15c4   :  { %1181 = vsyncpa [#allocation5], 1 }

</bundles_post_ra>
